<compile_context>
chip_gen: v7x
topology: tpu7x:2x2x1
jax: 0.10.0
libtpu: 0.0.40
codegen_flags: <defaults>
</compile_context>

<pallas_src>
import jax
import jax.numpy as jnp
from jax.experimental import pallas as pl
from jax.experimental.pallas import tpu as pltpu


def _round_up(v, m):
    return (v + m - 1) // m * m


def _make_avgpool_kernel(inv_hw):
    def kernel(x_ref, o_ref, acc_ref):
        # x_ref:   (TB, TC, THW)  -- HW on lanes, C on sublanes
        # o_ref:   (TB, TC)
        # acc_ref: (TB, TC) f32 scratch, resident across the reduction axis
        s = pl.program_id(2)

        @pl.when(s == 0)
        def _init():
            acc_ref[...] = jnp.zeros_like(acc_ref)

        # Last-axis (lane) reduction; .astype is a no-op for f32 inputs and
        # upcasts bf16/fp16 so accumulation stays in f32.
        acc_ref[...] += jnp.sum(x_ref[...].astype(jnp.float32), axis=-1)

        @pl.when(s == pl.num_programs(2) - 1)
        def _finish():
            o_ref[...] = (acc_ref[...] * inv_hw).astype(o_ref.dtype)

    return kernel


def _pick_tiles(B, C, HW, itemsize, budget):
    """Choose (tb, tc, thw) so one input block stays under `budget` bytes of
    (padded) VMEM while keeping the last two block dims aligned (8, 128) or
    equal to the full array extent."""
    lane_hw = _round_up(HW, 128)   # physical lane padding of the HW axis
    sub_c = _round_up(C, 8)        # physical sublane padding of the C axis

    # Enormous feature map: even 8 channel-rows of the full HW don't fit ->
    # tile the reduction axis itself (lane-aligned chunks), minimal b/c tile.
    if 8 * lane_hw * itemsize > budget:
        thw = max(128, (budget // (8 * itemsize)) // 128 * 128)
        return 1, min(C, 8), thw

    thw = HW
    rows = budget // (lane_hw * itemsize)   # (batch*channel) sublane rows affordable

    if sub_c <= rows:
        # Full channel extent per block -> lane-dense (tb, C) output tiles.
        tb = min(B, max(1, rows // sub_c))
        if tb < B and tb >= 8:
            tb -= tb % 8            # sublane-aligned batch tiles
        return tb, C, thw

    # Channels alone overflow the budget: tile channels (lane-aligned chunks
    # for the output, sublane-aligned for the input), one batch row at a time.
    tc = rows - rows % 128 if rows >= 128 else rows - rows % 8
    tc = max(8, min(tc, C))
    return 1, tc, thw


def classifier_forward(x, *, vmem_budget_bytes=6 * 1024 * 1024):
    """Adaptive average pool to 1x1 + flatten as a single-pass Pallas TPU kernel.

    x: (B, C, H, W)  ->  (B, C)
    """
    B, C, H, W = x.shape
    HW = H * W

    # Free reshape (contiguous, no data movement): keep NCHW-native layout.
    x_flat = x.reshape(B, C, HW)

    itemsize = jnp.dtype(x.dtype).itemsize
    tb, tc, thw = _pick_tiles(B, C, HW, itemsize, vmem_budget_bytes)

    hw_total = HW
    if thw < HW:
        # Zero-pad the reduction axis so partial blocks never fold garbage
        # into the sum (only hit for very large feature maps).
        pad = _round_up(HW, thw) - HW
        if pad:
            x_flat = jnp.pad(x_flat, ((0, 0), (0, 0), (0, pad)))
        hw_total = HW + pad

    grid = (pl.cdiv(B, tb), pl.cdiv(C, tc), hw_total // thw)

    kernel = _make_avgpool_kernel(1.0 / float(HW))

    return pl.pallas_call(
        kernel,
        out_shape=jax.ShapeDtypeStruct((B, C), x.dtype),
        grid=grid,
        in_specs=[pl.BlockSpec((tb, tc, thw), lambda b, c, s: (b, c, s))],
        out_specs=pl.BlockSpec((tb, tc), lambda b, c, s: (b, c)),
        scratch_shapes=[pltpu.VMEM((tb, tc), jnp.float32)],
        compiler_params=pltpu.CompilerParams(
            dimension_semantics=("parallel", "parallel", "arbitrary"),
            vmem_limit_bytes=32 * 1024 * 1024,
        ),
    )(x_flat)


if __name__ == "__main__":
    key = jax.random.PRNGKey(0)
    # Small NCHW feature map consistent with the module's forward.
    x = jax.random.normal(key, (2, 4, 16, 16), dtype=jnp.float32)

    out = jax.block_until_ready(classifier_forward(x))

    # Reference: adaptive avg-pool to 1x1 + flatten == mean over spatial dims.
    ref = jnp.mean(x, axis=(2, 3))
    assert out.shape == (2, 4), out.shape
    assert jnp.allclose(out, ref, atol=1e-5, rtol=1e-5), "mismatch vs reference"

    print("KERNEL_OK")
</pallas_src>

<mosaic_0001>
module attributes {stable_mosaic.version = 11 : i64} {
  func.func @kernel(%arg0: i32, %arg1: i32, %arg2: i32, %arg3: memref<2x4x256xf32, #tpu.memory_space<vmem>>, %arg4: memref<2x4xf32, #tpu.memory_space<vmem>>, %arg5: memref<2x4xf32, #tpu.memory_space<vmem>>) attributes {dimension_semantics = [#tpu.dimension_semantics<parallel>, #tpu.dimension_semantics<parallel>, #tpu.dimension_semantics<arbitrary>], iteration_bounds = array<i64: 1, 1, 1>, scalar_prefetch = 0 : i64, scratch_operands = 1 : i64, tpu.core_type = #tpu.core_type<tc>, window_params = [{transform_indices = @transform_0, window_bounds = array<i64: 2, 4, 256>}, {transform_indices = @transform_1, window_bounds = array<i64: 2, 4>}]} {
    %c0_i32 = arith.constant 0 : i32
    %0 = arith.cmpi eq, %arg2, %c0_i32 : i32
    %1 = arith.extui %0 : i1 to i32
    %c0_i32_0 = arith.constant 0 : i32
    %2 = arith.cmpi ne, %1, %c0_i32_0 : i32
    scf.if %2 {
      %cst_9 = arith.constant 0.000000e+00 : f32
      %11 = vector.broadcast %cst_9 : f32 to vector<2x4xf32>
      %c0_10 = arith.constant 0 : index
      %c0_11 = arith.constant 0 : index
      %12 = vector.load %arg5[%c0_10, %c0_11] : memref<2x4xf32, #tpu.memory_space<vmem>>, vector<2x4xf32>
      tpu.vector_store %arg5[%c0_10, %c0_11], %11 {strides = array<i32>} : memref<2x4xf32, #tpu.memory_space<vmem>>, vector<2x4xf32>,
    } else {
    }
    %c0 = arith.constant 0 : index
    %c0_1 = arith.constant 0 : index
    %3 = vector.load %arg5[%c0, %c0_1] : memref<2x4xf32, #tpu.memory_space<vmem>>, vector<2x4xf32>
    %c0_2 = arith.constant 0 : index
    %c0_3 = arith.constant 0 : index
    %c0_4 = arith.constant 0 : index
    %4 = vector.load %arg3[%c0_2, %c0_3, %c0_4] : memref<2x4x256xf32, #tpu.memory_space<vmem>>, vector<2x4x256xf32>
    %cst = arith.constant dense<0.000000e+00> : vector<2x4xf32>
    %5 = vector.multi_reduction <add>, %4, %cst [2] : vector<2x4x256xf32> to vector<2x4xf32>
    %6 = arith.addf %3, %5 : vector<2x4xf32>
    %c0_5 = arith.constant 0 : index
    %c0_6 = arith.constant 0 : index
    %7 = vector.load %arg5[%c0_5, %c0_6] : memref<2x4xf32, #tpu.memory_space<vmem>>, vector<2x4xf32>
    tpu.vector_store %arg5[%c0_5, %c0_6], %6 {strides = array<i32>} : memref<2x4xf32, #tpu.memory_space<vmem>>, vector<2x4xf32>,
    %c0_i32_7 = arith.constant 0 : i32
    %8 = arith.cmpi eq, %arg2, %c0_i32_7 : i32
    %9 = arith.extui %8 : i1 to i32
    %c0_i32_8 = arith.constant 0 : i32
    %10 = arith.cmpi ne, %9, %c0_i32_8 : i32
    scf.if %10 {
      %c0_9 = arith.constant 0 : index
      %c0_10 = arith.constant 0 : index
      %11 = vector.load %arg5[%c0_9, %c0_10] : memref<2x4xf32, #tpu.memory_space<vmem>>, vector<2x4xf32>
      %cst_11 = arith.constant 3.906250e-03 : f32
      %12 = vector.broadcast %cst_11 : f32 to vector<2x4xf32>
      %13 = arith.mulf %11, %12 : vector<2x4xf32>
      %c0_12 = arith.constant 0 : index
      %c0_13 = arith.constant 0 : index
      %14 = vector.load %arg4[%c0_12, %c0_13] : memref<2x4xf32, #tpu.memory_space<vmem>>, vector<2x4xf32>
      tpu.vector_store %arg4[%c0_12, %c0_13], %13 {strides = array<i32>} : memref<2x4xf32, #tpu.memory_space<vmem>>, vector<2x4xf32>,
    } else {
    }
    return
  }
  func.func @transform_0(%arg0: i32, %arg1: i32, %arg2: i32) -> (i32, i32, i32) {
    %c0_i32 = arith.constant 0 : i32
    return %arg0, %arg1, %arg2 : i32, i32, i32
  }
  func.func @transform_1(%arg0: i32, %arg1: i32, %arg2: i32) -> (i32, i32) {
    %c0_i32 = arith.constant 0 : i32
    return %arg0, %arg1 : i32, i32
  }
}

</mosaic_0001>

<bundles_post_ra>
// kernel: tpu_custom_call.1
= control target key start
LH: loop header
LB: loop body
LE: loop exit
PB: predicated region body
PF: predicated region fallthrough
CT: control target
= control target key end

     0   :  { %6 = vsyncpa [#allocation4], 0  ;;  %s185_s0 = inlined_call_operand.hbm [shape: f32[2,4,256], index: 0, kind: input, shape index: {}]   ;;  %s186_s1 = inlined_call_operand.hbm [shape: f32[2,4], index: 1, kind: output, shape index: {}]  }
   0x1   :  { %7 = vsyncpa [#allocation5], 0  ;;  %s143_s6 = smov [#allocation3]   ;;  %s95_s10 = scalar_lea.hbm %s185_s0, 256 }
   0x2   :  { %s13_s7 = sshll.u32 %s143_s6, 4  ;;  %p96_p0 = scmp.ne.s32.totalorder %s185_s0, %s95_s10  ;;  %s14_s7 = int_to_ptr.vmem [resolvable:$true] %s13_s7 }
   0x3   :  { %p99_p1 = scmp.lt.u32.totalorder %s95_s10, %s185_s0 }
   0x5   :  { %p101_p2 = pnand %p99_p1, %p96_p0 }
   0x7   :  { %104 = shalt.err (!%p101_p2)
}
   0x8   :  { %s105_s15 = scalar_lea.vmem %s14_s7, 256  ;;  %p110_p4 = scmp.lt.s32.totalorder %s14_s7, %s14_s7 }
   0x9   :  { %p106_p3 = scmp.ne.s32.totalorder %s14_s7, %s105_s15  ;;  %p111_p5 = scmp.lt.s32.totalorder %s105_s15, %s105_s15 }
   0xb   :  { %p112_p6 = por %p111_p5, %p110_p4 }
   0xd   :  { %p113_p7 = pnand %p112_p6, %p106_p3 }
   0xf   :  { %116 = shalt.err (!%p113_p7)
}
  0x10   :  { %s144_s16 = smov 128   ;;  %s145_s17 = smov 8  }
  0x11   :  { %19 = dma.hbm_to_vmem [thread:$0]  %s185_s0, 256, %s14_s7, [#allocation4], %s144_s16, %s144_s16, %s145_s17  }
  0x12   :  { %139 = dma.done.wait [#allocation4], 256  }
  0x13   :  { %140 = vsyncadd [#allocation4], 4294967040  ;;  %vm38_vm0 = vcmask 1043456   ;;  %v30_v0 = vld [vmem:[#allocation3] sm:$0xff]  ;;  %v31_v1 = vld [vmem:[#allocation3 + $0x8] sm:$0xff]  ;;  %vm27_vm1 = vcmask 25600   ;;  %v51_v11 = vlaneseq }
  0x14   :  { %v34_v2 = vcombine.high %v30_v0, %v30_v0  ;;  %v39_v3 = vsel %vm38_vm0, %v30_v0, 0.0  ;;  %v35_v4 = vcombine.high %v31_v1, %v31_v1  ;;  %v44_v6 = vsel %vm38_vm0, %v31_v1, 0.0  ;;  %s147_s0 = smov [#allocation6]  }
  0x15   :  { %v146_v10 = vmov 0.0   ;;  %v52_v12 = vand.u32 127, %v51_v11  ;;  %v54_v13 = vshrl.u32 %v51_v11, 7  ;;  %vm61_vm2 = vcmask 1041409   ;;  %s79_s20 = sshll.u32 %s147_s0, 4  ;;  %s80_s20 = int_to_ptr.vmem [resolvable:$true] %s79_s20 }
  0x16   :  { %v40_v5 = vsel %vm38_vm0, %v34_v2, 0.0  ;;  %v45_v7 = vsel %vm38_vm0, %v35_v4, 0.0  ;;  %28 = vst.msk [vmem:[#allocation2] sm:$0x3] %vm27_vm1, %v146_v10  ;;  %s117_s21 = scalar_lea.vmem %s80_s20, 32  ;;  %p122_p9 = scmp.lt.s32.totalorder %s80_s20, %s80_s20 }
  0x17   :  { %v41_v8 = vadd.f32 %v40_v5, %v39_v3  ;;  %v46_v9 = vadd.f32 %v45_v7, %v44_v6  ;;  %v55_v15 = vsub.s32 %v52_v12, %v54_v13  ;;  %p118_p8 = scmp.ne.s32.totalorder %s80_s20, %s117_s21  ;;  %p123_p10 = scmp.lt.s32.totalorder %s117_s21, %s117_s21 }
  0x19   :  { %42 = vadd.xlane.f32.xlu0 %v41_v8  ;;  %p124_p11 = por %p123_p10, %p122_p9 }
  0x1b   :  { %p125_p12 = pnand %p124_p11, %p118_p8 }
  0x1d   :  { %47 = vadd.xlane.f32.xlu0 %v46_v9  ;;  %v29_v19 = vld [vmem:[#allocation2] sm:$0x3] }
  0xa6   :  { %v43_v14 = vpop.xlane.xlu0 %42 }
  0xa7   :  { %v56_v17 = vrot.slane %v43_v14, %v55_v15 }
  0xaa   :  { %v48_v16 = vpop.xlane.xlu0 %47 }
  0xab   :  { %v60_v18 = vrot.slane %v48_v16, %v55_v15 }
  0xad   :  { %v62_v20 = vsel %vm61_vm2, %v60_v18, %v56_v17 }
  0xae   :  { %v64_v21 = vadd.f32 %v62_v20, %v29_v19 }
  0xb0   :  { %66 = vst.msk [vmem:[#allocation2] sm:$0x3] %vm27_vm1, %v64_v21 }
  0xb7   :  { %v70_v22 = vld [vmem:[#allocation2] sm:$0x3] }
  0xb8   :  { %v71_v23 = vmul.f32 0.00390625, %v70_v22 }
  0xba   :  { %72 = vst.msk [vmem:[#allocation6] sm:$0x3] %vm27_vm1, %v71_v23 }
  0xbb   :  { %128 = shalt.err (!%p125_p12)
}
  0xbc   :  { %s129_s24 = scalar_lea.hbm %s186_s1, 32 }
  0xbd   :  { %p130_p13 = scmp.ne.s32.totalorder %s186_s1, %s129_s24  ;;  %p133_p0 = scmp.lt.u32.totalorder %s129_s24, %s186_s1 }
  0xbf   :  { %p135_p1 = pnand %p133_p0, %p130_p13 }
  0xc1   :  { %138 = shalt.err (!%p135_p1)
}
  0xc2   :  { %82 = dma.vmem_to_hbm [thread:$0]  %s80_s20, 32, %s186_s1, [#allocation5]  }
  0xc3   :  { %141 = dma.done.wait [#allocation5], 32  }
  0xc4   :  { %142 = vsyncadd [#allocation5], 4294967264 }
  0xc5   :  { %86 = vsyncpa [#allocation4], 1 }
  0xc6   :  { %87 = vsyncpa [#allocation5], 1 }

</bundles_post_ra>
